<compile_context>
chip_gen: v6e
topology: v6e:2x2x1
jax: 0.10.0
libtpu: 0.0.40
codegen_flags: <defaults>
</compile_context>

<pallas_src>
import jax
import jax.numpy as jnp
from jax.experimental import pallas as pl
from jax.experimental.pallas import tpu as pltpu


# ---------------------------------------------------------------------------
# Kernel
# ---------------------------------------------------------------------------
def koopman_psi_kernel(x_ref, w_pre_ref, b_pre_ref, a_ext_ref, w_out_ref, b_out_ref, out_ref):
    """out = x @ A_ext + tanh(x @ W_pre + b_pre) @ W_out + b_out   (one batch tile, all f32)."""
    x = x_ref[...]                                                    # (bt, d)

    # Folded pre-tanh affine stack; tanh goes to the EUP.
    h = jnp.tanh(
        jnp.dot(x, w_pre_ref[...], preferred_element_type=jnp.float32) + b_pre_ref[...]
    )                                                                 # (bt, H)

    # Output = const/identity passthrough + trainable psi block + fused bias.
    # HIGHEST precision on the identity passthrough keeps the copied x columns exact.
    out = (
        jnp.dot(x, a_ext_ref[...],
                preferred_element_type=jnp.float32,
                precision=jax.lax.Precision.HIGHEST)
        + jnp.dot(h, w_out_ref[...], preferred_element_type=jnp.float32)
        + b_out_ref[...]
    )                                                                 # (bt, 1 + d + n_psi)
    out_ref[...] = out


# ---------------------------------------------------------------------------
# Host-side parameter preparation (done once, NOT per forward call)
# ---------------------------------------------------------------------------
def prepare_params(params):
    """Fold the pre-tanh linear chain and the output concat into dense f32 kernel operands."""
    d = params["hidden_w"][0].shape[1]                       # input_size

    # Fold Linear(d, L0, bias=False) @ Linear(L0, L1, bias=True) @ ... (no nonlinearity between).
    w_pre = params["hidden_w"][0].T.astype(jnp.float32)      # (d, L0)
    b_pre = jnp.zeros((w_pre.shape[1],), jnp.float32)
    for w_i, b_i in zip(params["hidden_w"][1:], params["hidden_b"]):
        w_pre = w_pre @ w_i.T
        b_pre = b_pre @ w_i.T + b_i

    H = w_pre.shape[1]
    n_psi = params["out_w"].shape[0]
    out_dim = 1 + d + n_psi

    # out = x @ a_ext + h @ w_out + b_out == concat([1, x, h @ W_last.T + b_last], axis=1)
    a_ext = jnp.zeros((d, out_dim), jnp.float32).at[:, 1:1 + d].set(jnp.eye(d, dtype=jnp.float32))
    w_out = jnp.zeros((H, out_dim), jnp.float32).at[:, 1 + d:].set(params["out_w"].T)
    b_out = (
        jnp.zeros((1, out_dim), jnp.float32)
        .at[0, 0].set(1.0)
        .at[0, 1 + d:].set(params["out_b"])
    )

    return {
        "w_pre": w_pre,                                    # (d, H)
        "b_pre": b_pre.reshape(1, -1),                     # (1, H)
        "a_ext": a_ext,                                    # (d, out_dim)
        "w_out": w_out,                                    # (H, out_dim)
        "b_out": b_out,                                    # (1, out_dim)
        # Unpadded final layer, used only by the small-batch (non-Pallas) fast path.
        "w_psi": params["out_w"].T.astype(jnp.float32),    # (H, n_psi)
        "b_psi": params["out_b"].astype(jnp.float32),      # (n_psi,)
    }


def _round_up(n, m):
    return ((n + m - 1) // m) * m


# ---------------------------------------------------------------------------
# Forward wrapper
# ---------------------------------------------------------------------------
def koopman_forward(x, prep, *, batch_tile=None, small_batch_threshold=256):
    """out[b] = [1, x[b], psi(x[b])], matching KoopmanNNTorch.forward."""
    squeeze_back = x.ndim == 1
    if squeeze_back:
        x = x[None, :]
    x = x.astype(jnp.float32)

    batch, d = x.shape
    out_dim = prep["b_out"].shape[1]
    H = prep["w_pre"].shape[1]

    # Small-batch fast path: the custom-call launch + pipeline prologue exceeds the whole
    # compute; XLA fuses the two tiny matmuls + tanh + concat fine.
    if batch <= small_batch_threshold:
        h = jnp.tanh(x @ prep["w_pre"] + prep["b_pre"])
        psi = h @ prep["w_psi"] + prep["b_psi"]
        out = jnp.concatenate([jnp.ones((batch, 1), jnp.float32), x, psi], axis=1)
        return out[0] if squeeze_back else out

    # Batch-tile selection (kernel is HBM / per-grid-step-overhead bound):
    #  * big tiles amortize the ~0.35 us fixed per-step cost,
    #  * cap at 8192 rows so the live VMEM (double-buffered x/out blocks + f32 intermediates,
    #    ~0.6 KB/row -> ~5-6 MB) also fits v7x's 64 MiB part,
    #  * keep grid >= 2 when possible so ("parallel",) shards the batch across both
    #    v7x TensorCores.
    bt_cap = batch_tile if batch_tile is not None else 8192
    half = _round_up(-(-batch // 2), 8)          # smallest 8-multiple covering half the batch
    bt = max(8, min(bt_cap, half))
    grid = (pl.cdiv(batch, bt),)                 # ragged last tile: Pallas masks OOB rows,
                                                 # no wrapper-side jnp.pad / out[:batch] slice

    weight_bytes = sum(prep[k].size * 4 for k in ("w_pre", "b_pre", "a_ext", "w_out", "b_out"))
    cost = pl.CostEstimate(
        flops=int(2 * batch * (d * H + H * out_dim + d * out_dim)),
        transcendentals=int(batch * H),
        bytes_accessed=int(batch * (d + out_dim) * 4 + weight_bytes),
    )

    out = pl.pallas_call(
        koopman_psi_kernel,
        out_shape=jax.ShapeDtypeStruct((batch, out_dim), jnp.float32),
        grid=grid,
        in_specs=[
            pl.BlockSpec((bt, d), lambda i: (i, 0)),                  # x: tiled over batch
            pl.BlockSpec(prep["w_pre"].shape, lambda i: (0, 0)),      # weights: VMEM-resident
            pl.BlockSpec(prep["b_pre"].shape, lambda i: (0, 0)),
            pl.BlockSpec(prep["a_ext"].shape, lambda i: (0, 0)),
            pl.BlockSpec(prep["w_out"].shape, lambda i: (0, 0)),
            pl.BlockSpec(prep["b_out"].shape, lambda i: (0, 0)),
        ],
        out_specs=pl.BlockSpec((bt, out_dim), lambda i: (i, 0)),
        compiler_params=pltpu.CompilerParams(
            dimension_semantics=("parallel",),   # batch axis shards across v7x's 2 TensorCores
        ),
        cost_estimate=cost,
    )(x, prep["w_pre"], prep["b_pre"], prep["a_ext"], prep["w_out"], prep["b_out"])

    return out[0] if squeeze_back else out


# ---------------------------------------------------------------------------
# Synthetic init (PyTorch weight layout: (out_features, in_features)) + pure-JAX reference
# ---------------------------------------------------------------------------
def init_params(key, input_size, layer_sizes, n_psi_train, scale=0.1):
    n_hidden = len(layer_sizes)
    keys = jax.random.split(key, 2 * n_hidden + 1)
    hidden_w = [scale * jax.random.normal(keys[0], (layer_sizes[0], input_size), jnp.float32)]
    hidden_b = []
    for i in range(1, n_hidden):
        hidden_w.append(
            scale * jax.random.normal(keys[2 * i - 1], (layer_sizes[i], layer_sizes[i - 1]), jnp.float32)
        )
        hidden_b.append(scale * jax.random.normal(keys[2 * i], (layer_sizes[i],), jnp.float32))
    out_w = scale * jax.random.normal(keys[2 * n_hidden - 1], (n_psi_train, layer_sizes[-1]), jnp.float32)
    out_b = scale * jax.random.normal(keys[2 * n_hidden], (n_psi_train,), jnp.float32)
    return {"hidden_w": hidden_w, "hidden_b": hidden_b, "out_w": out_w, "out_b": out_b}


def reference_forward(x, params):
    """Pure-JAX replica of KoopmanNNTorch.forward (unfused, f32)."""
    squeeze_back = x.ndim == 1
    if squeeze_back:
        x = x[None, :]
    h = x @ params["hidden_w"][0].T                           # Linear, bias=False
    for w_i, b_i in zip(params["hidden_w"][1:], params["hidden_b"]):
        h = h @ w_i.T + b_i                                   # Linear, bias=True
    h = jnp.tanh(h)                                           # single Tanh after the stack
    psi = h @ params["out_w"].T + params["out_b"]             # final Linear, bias=True
    const = jnp.ones((x.shape[0], 1), x.dtype)
    out = jnp.concatenate([const, x, psi], axis=1)
    if squeeze_back:
        out = out[0]
    return out


# ---------------------------------------------------------------------------
if __name__ == "__main__":
    input_size = 4
    layer_sizes = [64, 64]
    n_psi_train = 22
    out_dim = 1 + input_size + n_psi_train

    key = jax.random.PRNGKey(0)
    kx, kp, kx2 = jax.random.split(key, 3)
    params = init_params(kp, input_size, layer_sizes, n_psi_train)
    prep = prepare_params(params)

    # 1) Small batch, Pallas path forced: kernel correctness at tiny shapes.
    x_small = jax.random.normal(kx, (8, input_size), jnp.float32)
    ref_small = reference_forward(x_small, params)
    out_small = jax.block_until_ready(koopman_forward(x_small, prep, small_batch_threshold=0))
    assert out_small.shape == (8, out_dim)
    assert jnp.allclose(out_small, ref_small, atol=1e-4, rtol=1e-4), "kernel mismatch (small batch)"
    # passthrough columns (const 1 and x) must be (near-)exact thanks to the HIGHEST-precision dot
    assert jnp.allclose(out_small[:, 0], 1.0, atol=1e-6), "constant column not exact"
    assert jnp.allclose(out_small[:, 1:1 + input_size], x_small, atol=1e-6), "x passthrough not exact"

    # 2) Ragged batch (not a multiple of the tile), default path: exercises grid >= 2 and
    #    the masked trailing block (no wrapper-side pad/slice).
    x_big = jax.random.normal(kx2, (1000, input_size), jnp.float32)
    ref_big = reference_forward(x_big, params)
    out_big = jax.block_until_ready(koopman_forward(x_big, prep))
    assert out_big.shape == (1000, out_dim)
    assert jnp.allclose(out_big, ref_big, atol=1e-4, rtol=1e-4), "kernel mismatch (ragged batch)"

    # 3) 1-D input (squeeze_back branch of the PyTorch forward): small-batch fast path.
    out_1d = jax.block_until_ready(koopman_forward(x_small[0], prep))
    assert out_1d.shape == (out_dim,)
    assert jnp.allclose(out_1d, ref_small[0], atol=1e-4, rtol=1e-4), "kernel mismatch (1-D input)"

    print("KERNEL_OK")
</pallas_src>

<mosaic_0001>
module attributes {stable_mosaic.version = 11 : i64} {
  func.func @koopman_psi_kernel(%arg0: i32, %arg1: memref<8x4xf32, #tpu.memory_space<vmem>>, %arg2: memref<4x64xf32, #tpu.memory_space<vmem>>, %arg3: memref<1x64xf32, #tpu.memory_space<vmem>>, %arg4: memref<4x27xf32, #tpu.memory_space<vmem>>, %arg5: memref<64x27xf32, #tpu.memory_space<vmem>>, %arg6: memref<1x27xf32, #tpu.memory_space<vmem>>, %arg7: memref<8x27xf32, #tpu.memory_space<vmem>>) attributes {dimension_semantics = [#tpu.dimension_semantics<parallel>], iteration_bounds = array<i64: 1>, scalar_prefetch = 0 : i64, scratch_operands = 0 : i64, tpu.core_type = #tpu.core_type<tc>, window_params = [{transform_indices = @transform_0, window_bounds = array<i64: 8, 4>}, {pipeline_mode = #tpu.pipeline_mode<synchronous>, transform_indices = @transform_1, window_bounds = array<i64: 4, 64>}, {pipeline_mode = #tpu.pipeline_mode<synchronous>, transform_indices = @transform_2, window_bounds = array<i64: 1, 64>}, {pipeline_mode = #tpu.pipeline_mode<synchronous>, transform_indices = @transform_3, window_bounds = array<i64: 4, 27>}, {pipeline_mode = #tpu.pipeline_mode<synchronous>, transform_indices = @transform_4, window_bounds = array<i64: 64, 27>}, {pipeline_mode = #tpu.pipeline_mode<synchronous>, transform_indices = @transform_5, window_bounds = array<i64: 1, 27>}, {transform_indices = @transform_6, window_bounds = array<i64: 8, 27>}]} {
    %c0 = arith.constant 0 : index
    %c0_0 = arith.constant 0 : index
    %0 = vector.load %arg1[%c0, %c0_0] : memref<8x4xf32, #tpu.memory_space<vmem>>, vector<8x4xf32>
    %c0_1 = arith.constant 0 : index
    %c0_2 = arith.constant 0 : index
    %1 = vector.load %arg2[%c0_1, %c0_2] : memref<4x64xf32, #tpu.memory_space<vmem>>, vector<4x64xf32>
    %cst = arith.constant dense<0.000000e+00> : vector<8x64xf32>
    %2 = tpu.matmul %0, %1, %cst {dimension_numbers = #tpu.dot_dimension_numbers<[1], [0], [0], [1], [0, 0, 1, 1], [], []>} : vector<8x4xf32>, vector<4x64xf32>, vector<8x64xf32> -> vector<8x64xf32>
    %c0_3 = arith.constant 0 : index
    %c0_4 = arith.constant 0 : index
    %3 = vector.load %arg3[%c0_3, %c0_4] : memref<1x64xf32, #tpu.memory_space<vmem>>, vector<1x64xf32>
    %4 = vector.broadcast %3 : vector<1x64xf32> to vector<8x64xf32>
    %5 = arith.addf %2, %4 : vector<8x64xf32>
    %6 = math.tanh %5 : vector<8x64xf32>
    %c0_5 = arith.constant 0 : index
    %c0_6 = arith.constant 0 : index
    %7 = vector.load %arg4[%c0_5, %c0_6] : memref<4x27xf32, #tpu.memory_space<vmem>>, vector<4x27xf32>
    %cst_7 = arith.constant dense<0.000000e+00> : vector<8x27xf32>
    %8 = tpu.matmul %0, %7, %cst_7 {dimension_numbers = #tpu.dot_dimension_numbers<[1], [0], [0], [1], [0, 0, 1, 1], [], []>, precision = #tpu.contract_precision<fp32>} : vector<8x4xf32>, vector<4x27xf32>, vector<8x27xf32> -> vector<8x27xf32>
    %c0_8 = arith.constant 0 : index
    %c0_9 = arith.constant 0 : index
    %9 = vector.load %arg5[%c0_8, %c0_9] : memref<64x27xf32, #tpu.memory_space<vmem>>, vector<64x27xf32>
    %cst_10 = arith.constant dense<0.000000e+00> : vector<8x27xf32>
    %10 = tpu.matmul %6, %9, %cst_10 {dimension_numbers = #tpu.dot_dimension_numbers<[1], [0], [0], [1], [0, 0, 1, 1], [], []>} : vector<8x64xf32>, vector<64x27xf32>, vector<8x27xf32> -> vector<8x27xf32>
    %11 = arith.addf %8, %10 : vector<8x27xf32>
    %c0_11 = arith.constant 0 : index
    %c0_12 = arith.constant 0 : index
    %12 = vector.load %arg6[%c0_11, %c0_12] : memref<1x27xf32, #tpu.memory_space<vmem>>, vector<1x27xf32>
    %13 = vector.broadcast %12 : vector<1x27xf32> to vector<8x27xf32>
    %14 = arith.addf %11, %13 : vector<8x27xf32>
    %c0_13 = arith.constant 0 : index
    %c0_14 = arith.constant 0 : index
    %15 = vector.load %arg7[%c0_13, %c0_14] : memref<8x27xf32, #tpu.memory_space<vmem>>, vector<8x27xf32>
    tpu.vector_store %arg7[%c0_13, %c0_14], %14 {strides = array<i32>} : memref<8x27xf32, #tpu.memory_space<vmem>>, vector<8x27xf32>,
    return
  }
  func.func @transform_0(%arg0: i32) -> (i32, i32) {
    %c0_i32 = arith.constant 0 : i32
    %c0_i32_0 = arith.constant 0 : i32
    return %arg0, %c0_i32 : i32, i32
  }
  func.func @transform_1(%arg0: i32) -> (i32, i32) {
    %c0_i32 = arith.constant 0 : i32
    %c0_i32_0 = arith.constant 0 : i32
    %c0_i32_1 = arith.constant 0 : i32
    return %c0_i32, %c0_i32_0 : i32, i32
  }
  func.func @transform_2(%arg0: i32) -> (i32, i32) {
    %c0_i32 = arith.constant 0 : i32
    %c0_i32_0 = arith.constant 0 : i32
    %c0_i32_1 = arith.constant 0 : i32
    return %c0_i32, %c0_i32_0 : i32, i32
  }
  func.func @transform_3(%arg0: i32) -> (i32, i32) {
    %c0_i32 = arith.constant 0 : i32
    %c0_i32_0 = arith.constant 0 : i32
    %c0_i32_1 = arith.constant 0 : i32
    return %c0_i32, %c0_i32_0 : i32, i32
  }
  func.func @transform_4(%arg0: i32) -> (i32, i32) {
    %c0_i32 = arith.constant 0 : i32
    %c0_i32_0 = arith.constant 0 : i32
    %c0_i32_1 = arith.constant 0 : i32
    return %c0_i32, %c0_i32_0 : i32, i32
  }
  func.func @transform_5(%arg0: i32) -> (i32, i32) {
    %c0_i32 = arith.constant 0 : i32
    %c0_i32_0 = arith.constant 0 : i32
    %c0_i32_1 = arith.constant 0 : i32
    return %c0_i32, %c0_i32_0 : i32, i32
  }
  func.func @transform_6(%arg0: i32) -> (i32, i32) {
    %c0_i32 = arith.constant 0 : i32
    %c0_i32_0 = arith.constant 0 : i32
    return %arg0, %c0_i32 : i32, i32
  }
}

</mosaic_0001>

<bundles_post_ra>
// kernel: tpu_custom_call.1
= control target key start
LH: loop header
LB: loop body
LE: loop exit
PB: predicated region body
PF: predicated region fallthrough
CT: control target
= control target key end

     0   :  { %vm37_vm0 = vcmask 1043456   ;;  %v777_v2 = vmov 0.0   ;;  %vm33_vm1 = vcmask 31744   ;;  %vm778_vm2 = vmmov 0   ;;  %s888_s0 = inlined_call_operand.vmem [shape: f32[8,4], index: 0, kind: input, shape index: {}]   ;;  %s889_s1 = inlined_call_operand.vmem [shape: f32[4,64], index: 1, kind: input, shape index: {}]   ;;  %s890_s2 = inlined_call_operand.vmem [shape: f32[1,64], index: 2, kind: input, shape index: {}]   ;;  %s891_s3 = inlined_call_operand.vmem [shape: f32[4,27], index: 3, kind: input, shape index: {}]   ;;  %s892_s4 = inlined_call_operand.vmem [shape: f32[64,27], index: 4, kind: input, shape index: {}]   ;;  %s893_s5 = inlined_call_operand.vmem [shape: f32[1,27], index: 5, kind: input, shape index: {}]   ;;  %s894_s6 = inlined_call_operand.hbm [shape: f32[8,27], index: 6, kind: output, shape index: {}]  }
   0x1   :  { %v25_v0 = vld [vmem:[%s889_s1] sm:$0xf]  ;;  %696 = vmatprep.subr.mxu0 %v777_v2  ;;  %701 = vmatprep.subr.mxu1 %v777_v2 }
   0x2   :  { %v112_v1 = vld [vmem:[%s891_s3] sm:$0xf]  ;;  %697 = vmatpush3.msk.msra.mxu0 %vm37_vm0, %v25_v0  ;;  %698 = vmatprep.mubr.msk.f32.mxu0 %vm778_vm2, %v777_v2 }
   0x3   :  { %v196_v3 = vsel %vm37_vm0, %v112_v1, 0  ;;  %v24_v4 = vld [vmem:[%s888_s0] sm:$0xff] }
   0x4   :  { %v229_v5 = vand.u32 4294901760, %v196_v3 }
   0x5   :  { %11 = vsyncpa [#allocation3], 0  ;;  %699 = vmatmul.mubr.msk.f32.vlgmr.msra.gmra.mxu0 %vm33_vm1, %v24_v4  ;;  %720 = vmatprep.subr.mxu0 %v777_v2  ;;  %v35_v6 = vsel %vm33_vm1, %v24_v4, 0  ;;  %v120_v11 = vld [vmem:[%s892_s4 + $0x38] sm:$0xff]  ;;  %v119_v12 = vld [vmem:[%s892_s4 + $0x30] sm:$0xff]  ;;  %vm121_vm3 = vcmask 523264  }
   0x6   :  { %721 = vmatpush3.msra.mxu0 %v229_v5  ;;  %722 = vmatprep.mubr.msk.f32.mxu0 %vm778_vm2, %v777_v2  ;;  %v306_v7 = vsub.f32 %v196_v3, %v229_v5  ;;  %v264_v8 = vand.u32 4294901760, %v35_v6  ;;  %v118_v13 = vld [vmem:[%s892_s4 + $0x28] sm:$0xff]  ;;  %v117_v16 = vld [vmem:[%s892_s4 + $0x20] sm:$0xff]  ;;  %v116_v20 = vld [vmem:[%s892_s4 + $0x18] sm:$0xff]  ;;  %s779_s18 = smov [#allocation2]   ;;  %vm652_vm4 = vcmask 220160  }
   0x7   :  { %725 = vmatprep.subr.mxu0 %v777_v2  ;;  %717 = vmatprep.mubr.msk.f32.mxu1 %vm778_vm2, %v777_v2  ;;  %v115_v21 = vld [vmem:[%s892_s4 + $0x10] sm:$0xff]  ;;  %v114_v22 = vld [vmem:[%s892_s4 + $0x8] sm:$0xff]  ;;  %v113_v23 = vld [vmem:[%s892_s4] sm:$0xff]  ;;  %s660_s19 = sshll.u32 %s779_s18, 4  ;;  %s661_s19 = int_to_ptr.vmem [resolvable:$true] %s660_s19 }
   0x8   :  { %v307_v9 = vand.u32 4294901760, %v306_v7  ;;  %v265_v10 = vsub.f32 %v35_v6, %v264_v8  ;;  %702 = vmatpush3.msra.mxu1 %v120_v11  ;;  %v668_v24 = vld [vmem:[%s890_s2] ss:$0 sm:$0xff]  ;;  %s755_s20 = scalar_lea.vmem %s661_s19, 128  ;;  %p760_p1 = scmp.lt.s32.totalorder %s661_s19, %s661_s19 }
   0x9   :  { %703 = vmatprep.subr.mxu1 %v777_v2  ;;  %v672_v48 = vld [vmem:[%s893_s5] ss:$0 sm:$0xff]  ;;  %p756_p0 = scmp.ne.s32.totalorder %s661_s19, %s755_s20  ;;  %p761_p2 = scmp.lt.s32.totalorder %s755_s20, %s755_s20 }
   0xa   :  { %v266_v14 = vand.u32 4294901760, %v265_v10  ;;  %v308_v15 = vsub.f32 %v306_v7, %v307_v9  ;;  %704 = vmatpush3.msra.mxu1 %v119_v12 }
   0xb   :  { %705 = vmatprep.subr.mxu1 %v777_v2  ;;  %p762_p3 = por %p761_p2, %p760_p1 }
   0xc   :  { %v267_v17 = vsub.f32 %v265_v10, %v266_v14  ;;  %706 = vmatpush3.msra.mxu1 %v118_v13  ;;  %v309_v18 = vand.u32 4294901760, %v308_v15 }
   0xd   :  { %707 = vmatprep.subr.mxu1 %v777_v2  ;;  %p763_p4 = pnand %p762_p3, %p756_p0 }
   0xe   :  { %v268_v19 = vand.u32 4294901760, %v267_v17  ;;  %708 = vmatpush3.msra.mxu1 %v117_v16 }
   0xf   :  { %709 = vmatprep.subr.mxu1 %v777_v2 }
  0x10   :  { %723 = vmatmul.mubr.f32.vlgmr.msra.gmra.mxu0 %v268_v19  ;;  %710 = vmatpush3.msra.mxu1 %v116_v20 }
  0x11   :  { %726 = vmatpush3.msra.mxu0 %v309_v18  ;;  %711 = vmatprep.subr.mxu1 %v777_v2 }
  0x12   :  { %727 = vmatprep.mubr.msk.f32.mxu0 %vm778_vm2, %v777_v2  ;;  %712 = vmatpush3.msra.mxu1 %v115_v21 }
  0x13   :  { %730 = vmatprep.subr.mxu0 %v777_v2  ;;  %713 = vmatprep.subr.mxu1 %v777_v2 }
  0x14   :  { %728 = vmatmul.mubr.f32.vlgmr.msra.gmra.mxu0 %v264_v8  ;;  %714 = vmatpush3.msra.mxu1 %v114_v22 }
  0x15   :  { %731 = vmatpush3.msra.mxu0 %v306_v7  ;;  %715 = vmatprep.subr.mxu1 %v777_v2 }
  0x16   :  { %732 = vmatprep.mubr.msk.f32.mxu0 %vm778_vm2, %v777_v2  ;;  %716 = vmatpush3.msra.mxu1 %v113_v23 }
  0x17   :  { %735 = vmatprep.subr.mxu0 %v777_v2  ;;  %740 = vmatprep.subr.mxu1 %v777_v2 }
  0x18   :  { %733 = vmatmul.mubr.f32.vlgmr.msra.gmra.mxu0 %v265_v10 }
  0x19   :  { %736 = vmatpush3.msra.mxu0 %v229_v5  ;;  %737 = vmatprep.mubr.msk.f32.mxu0 %vm778_vm2, %v777_v2 }
  0x1a   :  { %745 = vmatprep.subr.mxu0 %v777_v2 }
  0x1c   :  { %738 = vmatmul.mubr.f32.vlgmr.msra.gmra.mxu0 %v266_v14 }
  0x1d   :  { %746 = vmatpush3.msra.mxu0 %v229_v5  ;;  %747 = vmatprep.mubr.msk.f32.mxu0 %vm778_vm2, %v777_v2 }
  0x20   :  { %748 = vmatmul.mubr.f32.vlgmr.msra.gmra.mxu0 %v264_v8 }
  0xc5   :  { %v107_v25 = vpop.f32.mrf.mxu0 }
  0xc6   :  { %v108_v26 = vadd.f32 %v668_v24, %v107_v25 }
  0xc7   :  { %v700_v27 = vpop.f32.mrf.mxu0 }
  0xc8   :  { %753 = vtanh.f32 %v108_v26 }
  0xd0   :  { %v270_v29 = vpop.f32.mrf.mxu0 }
  0xd2   :  { %v724_v30 = vpop.f32.mrf.mxu0 }
  0xd4   :  { %v346_v31 = vpop.f32.mrf.mxu0 }
  0xd5   :  { %v754_v28 = vpop.eup %753 }
  0xd6   :  { %718 = vmatmul.mubr.msk.f32.vlgmr.msra.gmra.mxu1 %vm121_vm3, %v754_v28  ;;  %v729_v32 = vpop.f32.mrf.mxu0 }
  0xd7   :  { %741 = vmatpush3.msra.mxu1 %v307_v9  ;;  %742 = vmatprep.mubr.msk.f32.mxu1 %vm778_vm2, %v777_v2 }
  0xd8   :  { %v420_v33 = vpop.f32.mrf.mxu0 }
  0xda   :  { %743 = vmatmul.mubr.f32.vlgmr.msra.gmra.mxu1 %v264_v8  ;;  %v734_v34 = vpop.f32.mrf.mxu0 }
  0xdc   :  { %v494_v35 = vpop.f32.mrf.mxu0 }
  0xde   :  { %v739_v36 = vpop.f32.mrf.mxu0 }
  0xe0   :  { %v640_v37 = vpop.f32.mrf.mxu0 }
  0xe2   :  { %v749_v38 = vpop.f32.mrf.mxu0 }
 0x196   :  { %v191_v39 = vpop.f32.mrf.mxu1 }
 0x197   :  { %v271_v40 = vadd.f32 %v270_v29, %v191_v39 }
 0x198   :  { %v719_v41 = vpop.f32.mrf.mxu1 }
 0x199   :  { %v347_v42 = vadd.f32 %v346_v31, %v271_v40 }
 0x19a   :  { %v568_v43 = vpop.f32.mrf.mxu1 }
 0x19b   :  { %v421_v44 = vadd.f32 %v420_v33, %v347_v42 }
 0x19c   :  { %v744_v45 = vpop.f32.mrf.mxu1 }
 0x19d   :  { %v495_v46 = vadd.f32 %v494_v35, %v421_v44 }
 0x19f   :  { %v569_v47 = vadd.f32 %v568_v43, %v495_v46 }
 0x1a1   :  { %v641_v49 = vadd.f32 %v640_v37, %v569_v47 }
 0x1a3   :  { %v651_v50 = vadd.f32 %v672_v48, %v641_v49 }
 0x1a5   :  { %653 = vst.msk [vmem:[#allocation2] sm:$0xff] %vm652_vm4, %v651_v50 }
 0x1a6   :  { %766 = shalt.err (!%p763_p4)
}
 0x1a7   :  { %663 = dma.vmem_to_hbm [thread:$0]  %s661_s19, 128, %s894_s6, [#allocation3]  }
 0x1a8   :  { %775 = dma.done.wait [#allocation3], 128  }
 0x1a9   :  { %776 = vsyncadd [#allocation3], 4294967168 }
 0x1aa   :  { %667 = vsyncpa [#allocation3], 1 }

</bundles_post_ra>
